<compile_context>
chip_gen: v7x
topology: tpu7x:2x2x1
jax: 0.10.0
libtpu: 0.0.40
codegen_flags: <defaults>
</compile_context>

<pallas_src>
import numpy as np
import jax
import jax.numpy as jnp
from jax.experimental import pallas as pl
from jax.experimental.pallas import tpu as pltpu


# ----------------------------- plain numpy glue ------------------------------

def _round_up(x: int, m: int) -> int:
    return ((x + m - 1) // m) * m


def sinusoidal_pos_embedding(d_model: int, max_len: int = 400, f: float = 1.0) -> np.ndarray:
    """Standard sinusoidal positional embedding; `f` flips the sign of positions."""
    pos = np.arange(max_len, dtype=np.float32)[:, None]
    idx = np.arange(d_model, dtype=np.float32)[None, :]
    div = np.power(10000.0, (2.0 * np.floor(idx / 2.0)) / d_model).astype(np.float32)
    angle = f * pos / div
    pe = np.zeros((max_len, d_model), dtype=np.float32)
    pe[:, 0::2] = np.sin(angle[:, 0::2])
    pe[:, 1::2] = np.cos(angle[:, 1::2])
    return pe


def build_relative_sinusoid(d_model: int, max_len: int) -> np.ndarray:
    """The module's registered `relative_sinusoid` buffer (used by the reference)."""
    pos_e = sinusoidal_pos_embedding(d_model, max_len, f=1.0)
    neg_e = sinusoidal_pos_embedding(d_model, max_len, f=-1.0)
    rel = np.zeros((max_len, max_len, d_model), dtype=np.float32)
    for i in range(max_len):
        for j in range(max_len):
            rel[i, j] = pos_e[j - i] if i <= j else neg_e[i - j]
    return rel


# ----------------------------- Pallas kernel ---------------------------------

def jump_dot_product_kernel(xq_ref, xk_ref, w_i_ref, w_k_ref, phi_ref,
                            cos_ref, sin_ref, edge_ref, qu_ref):
    """One grid step = (batch tile g, score-column tile j).

    xq_ref  : (Bt, S, Ds)   bf16  x rows for the query/i side (resident across j)
    xk_ref  : (Bt, Tj, Ds)  bf16  x rows for the key/j side (this j tile)
    w_i_ref : (Ds, 3*Dm)    bf16  [Wq | Wr | Wr_rot] * (1/sqrt(Dm)),  Wr = Wq2 @ Wk2^T
    w_k_ref : (Ds, Dm)      bf16  Wk
    phi_ref : (Tj, Dm)      bf16  positional rows Phi(j) for this j tile
    cos_ref : (S, Dm)       f32   cos(i * w_{d//2}) (each value repeated per pair)
    sin_ref : (S, Dm)       f32   sin(i * w_{d//2})
    edge_ref: (Bt, S, Tj)   out   edge-score tile
    qu_ref  : (Bt, S, 2*Dm) bf16  VMEM scratch [q | u], cached across the j tiles
    """
    Bt, S, Ds = xq_ref.shape
    Tj = xk_ref.shape[1]
    Dm = w_k_ref.shape[1]
    bf16 = jnp.bfloat16

    @pl.when(pl.program_id(1) == 0)
    def _():
        # Fused i-side projection (q, r, r_rot in one MXU matmul) + RoPE-style
        # rotation by the row position i, so that u[b,i].Phi(j) == r[b,i].Phi(j-i).
        # Done once per batch tile and cached in VMEM across the j tiles.
        proj = jnp.dot(xq_ref[...].reshape(Bt * S, Ds), w_i_ref[...],
                       preferred_element_type=jnp.float32).reshape(Bt, S, 3 * Dm)
        q = proj[:, :, 0 * Dm:1 * Dm]
        r = proj[:, :, 1 * Dm:2 * Dm]
        r_rot = proj[:, :, 2 * Dm:3 * Dm]
        u = r * cos_ref[...][None, :, :] + r_rot * sin_ref[...][None, :, :]
        qu_ref[...] = jnp.concatenate([q, u], axis=-1).astype(bf16)

    # j-side: project this tile's x rows to k, build the fused RHS [k | Phi(j)],
    # and do ONE K = 2*Dm MXU accumulation (content + relative scores fused).
    k = jnp.dot(xk_ref[...].reshape(Bt * Tj, Ds), w_k_ref[...],
                preferred_element_type=jnp.float32).reshape(Bt, Tj, Dm)
    phi = jnp.broadcast_to(phi_ref[...][None, :, :], (Bt, Tj, Dm))
    rhs = jnp.concatenate([k.astype(bf16), phi], axis=-1)            # (Bt, Tj, 2*Dm)
    scores = jnp.einsum('bid,bjd->bij', qu_ref[...], rhs,
                        preferred_element_type=jnp.float32)          # (Bt, S, Tj)
    edge_ref[...] = scores.astype(edge_ref.dtype)                    # scale already folded in


# ----------------------------- wrapper ----------------------------------------

def jump_dot_product(x, mask, wq, wk, wq2, wk2, rel_sin=None, *,
                     batch_tile=None, out_dtype=None):
    """edge_scores, alignment_mask = JumpDotProduct.forward(x, mask).

    x: (B,S,Ds); mask: (B,S); wq/wk/wq2: (Ds,Dm); wk2: (Dm,Dm) stored (in,out): y = x @ W.
    `rel_sin` (the module's registered buffer) is accepted for interface parity but the
    positional tables are re-derived analytically from d_model (the buffer is a fixed,
    non-learned sinusoid); see the sanity check in __main__.
    Pass out_dtype=jnp.bfloat16 to halve the edge-score HBM write traffic.
    """
    del rel_sin
    B, S, Ds = x.shape
    Dm = wq.shape[1]
    assert Dm % 2 == 0
    f32, bf16 = jnp.float32, jnp.bfloat16
    out_dtype = jnp.dtype(out_dtype if out_dtype is not None else x.dtype)

    # ---- geometry / padding ---------------------------------------------------
    S_pad = _round_up(S, 8)              # layout-free in-kernel reshapes need S % 8 == 0
    if S_pad <= 1024:
        Tj = S_pad                       # single j tile (full-extent last dim is allowed)
    else:
        # j-tile the (S,S) output in 128-lane chunks: lane-dense stores + bounded VMEM.
        S_pad = _round_up(S_pad, 128)
        Tj = 512 if S_pad % 512 == 0 else (256 if S_pad % 256 == 0 else 128)
    nj = S_pad // Tj
    Ds_pad = _round_up(Ds, 8)

    # ---- batch-invariant preprocessing (hoisted off the per-step path) --------
    # Phi(p)[2t] = sin(p*w_t), Phi(p)[2t+1] = cos(p*w_t); identical for both triangles
    # of the relative buffer, so the whole relative path reduces to u[b,i].Phi(j).
    half = np.arange(Dm // 2, dtype=np.float64)
    inv_freq = 1.0 / np.power(10000.0, 2.0 * half / Dm)                 # w_t
    ang = np.arange(S_pad, dtype=np.float64)[:, None] * inv_freq[None, :]
    sin_h, cos_h = np.sin(ang), np.cos(ang)
    phi_tab = jnp.asarray(np.stack([sin_h, cos_h], axis=-1).reshape(S_pad, Dm), bf16)
    cos_tab = jnp.asarray(np.repeat(cos_h, 2, axis=1), f32)             # (S_pad, Dm)
    sin_tab = jnp.asarray(np.repeat(sin_h, 2, axis=1), f32)

    # Fold Wk2 into the q2 projection, build its pair-swapped/signed twin for the
    # elementwise rotation, and fold 1/sqrt(Dm) into the i-side weight columns.
    inv_scale = 1.0 / float(np.sqrt(Dm))
    wr = wq2.astype(f32) @ wk2.astype(f32).T                            # (Ds, Dm)
    wr_rot = jnp.stack([wr[:, 1::2], -wr[:, 0::2]], axis=-1).reshape(Ds, Dm)
    w_i = jnp.concatenate([wq.astype(f32), wr, wr_rot], axis=1) * inv_scale
    w_k = wk.astype(f32)
    if Ds_pad != Ds:
        pad = ((0, Ds_pad - Ds), (0, 0))
        w_i = jnp.pad(w_i, pad)
        w_k = jnp.pad(w_k, pad)
    w_i = w_i.astype(bf16)                                              # (Ds_pad, 3*Dm)
    w_k = w_k.astype(bf16)                                              # (Ds_pad, Dm)

    # ---- VMEM-aware batch tiling ----------------------------------------------
    out_bytes = int(out_dtype.itemsize)
    per_b = (2 * (S_pad * Ds_pad * 2)          # x (query side), bf16, double-buffered
             + 2 * (Tj * Ds_pad * 2)           # x (key side) tile
             + 2 * (S_pad * Tj * out_bytes)    # edge output tile, double-buffered
             + S_pad * 2 * Dm * 2              # qu scratch (single buffer)
             + S_pad * Tj * 4)                 # live f32 score tile
    try:
        vmem_cap = int(pltpu.get_tpu_info().vmem_capacity_bytes)
    except Exception:
        vmem_cap = 64 * 1024 * 1024            # conservative (v7x-sized) fallback
    vmem_limit = min(vmem_cap * 3 // 4, 96 * 1024 * 1024)   # 48 MiB on v7x, 96 MiB on v5e/v6e
    tile_budget = vmem_limit * 3 // 5                        # pipeline / compiler headroom

    if batch_tile is None:
        bt_vmem = max(1, tile_budget // max(per_b, 1))
        bt_rows = max(1, 512 // S_pad)                       # ~512 MXU rows per step
        batch_tile = max(1, min(B, bt_vmem, bt_rows))
        if B >= 2:                                           # >=2 steps on the parallel axis
            batch_tile = min(batch_tile, (B + 1) // 2)       # (megacore / v7x dual TC)
    Bt = int(batch_tile)
    Bp = _round_up(B, Bt)

    xp = x.astype(bf16)
    if (Bp, S_pad, Ds_pad) != (B, S, Ds):
        xp = jnp.pad(xp, ((0, Bp - B), (0, S_pad - S), (0, Ds_pad - Ds)))

    flops = int(2 * Bp * S_pad * Ds_pad * 3 * Dm       # i-side fused projection
                + 2 * Bp * S_pad * Ds_pad * Dm         # j-side k projection
                + 2 * Bp * S_pad * S_pad * 2 * Dm      # fused content+relative score matmul
                + 4 * Bp * S_pad * Dm)                 # rotation
    bytes_accessed = int(2 * xp.size * 2 + w_i.size * 2 + w_k.size * 2
                         + phi_tab.size * 2 + cos_tab.size * 4 + sin_tab.size * 4
                         + Bp * S_pad * S_pad * out_bytes)

    edge = pl.pallas_call(
        jump_dot_product_kernel,
        out_shape=jax.ShapeDtypeStruct((Bp, S_pad, S_pad), out_dtype),
        grid_spec=pltpu.PrefetchScalarGridSpec(
            num_scalar_prefetch=0,
            grid=(Bp // Bt, nj),
            in_specs=[
                pl.BlockSpec((Bt, S_pad, Ds_pad), lambda g, j: (g, 0, 0)),  # x (query side)
                pl.BlockSpec((Bt, Tj, Ds_pad), lambda g, j: (g, j, 0)),     # x (key side)
                pl.BlockSpec((Ds_pad, 3 * Dm), lambda g, j: (0, 0)),        # [Wq|Wr|Wr_rot]/sqrt(Dm)
                pl.BlockSpec((Ds_pad, Dm), lambda g, j: (0, 0)),            # Wk
                pl.BlockSpec((Tj, Dm), lambda g, j: (j, 0)),                # Phi(j) tile
                pl.BlockSpec((S_pad, Dm), lambda g, j: (0, 0)),             # cos(i*w)
                pl.BlockSpec((S_pad, Dm), lambda g, j: (0, 0)),             # sin(i*w)
            ],
            out_specs=pl.BlockSpec((Bt, S_pad, Tj), lambda g, j: (g, 0, j)),
            scratch_shapes=[pltpu.VMEM((Bt, S_pad, 2 * Dm), bf16)],
        ),
        compiler_params=pltpu.CompilerParams(
            # j must stay "arbitrary": the qu scratch is filled at j==0 and reused.
            dimension_semantics=("parallel", "arbitrary"),
            vmem_limit_bytes=int(vmem_limit),
        ),
        cost_estimate=pl.CostEstimate(flops=flops, transcendentals=0,
                                      bytes_accessed=bytes_accessed),
    )(xp, xp, w_i, w_k, phi_tab, cos_tab, sin_tab)

    edge = edge[:B, :S, :S]

    # alignment_mask = mask.unsqueeze(1) * mask.unsqueeze(2): a boolean outer product.
    # It is NOT written by the kernel (it was half of the HBM write traffic of a
    # write-bound kernel); XLA materializes/fuses this broadcast into the consumer.
    maskf = mask.astype(f32)
    align = maskf[:, None, :] * maskf[:, :, None]
    return edge, align


# ----------------------------- pure-JAX reference ----------------------------

def jump_dot_product_ref(x, mask, wq, wk, wq2, wk2, rel_sin):
    S = x.shape[1]
    Dm = wq.shape[1]
    q = x @ wq
    k = x @ wk
    q2 = x @ wq2
    edge = jnp.einsum('bid,bjd->bij', q, k)
    rel = jnp.einsum('ijd,de->ije', rel_sin[:S, :S], wk2)
    rel_scores = jnp.einsum('bid,ijd->bij', q2, rel)
    edge = (edge + rel_scores) / jnp.sqrt(jnp.float32(Dm))
    align = mask[:, None, :] * mask[:, :, None]
    return edge, align


# ----------------------------- main -------------------------------------------

if __name__ == "__main__":
    batch, seq_len = 2, 8
    source_dim, d_model = 16, 32
    max_len = 16

    key = jax.random.PRNGKey(0)
    kx, km, k1, k2, k3, k4 = jax.random.split(key, 6)

    x = jax.random.normal(kx, (batch, seq_len, source_dim), dtype=jnp.float32)
    mask = (jax.random.uniform(km, (batch, seq_len)) > 0.3).astype(jnp.float32)

    # torch.nn.Linear(in, out, bias=False) weights, stored transposed as (in, out).
    wq = jax.random.normal(k1, (source_dim, d_model), dtype=jnp.float32) * 0.05
    wk = jax.random.normal(k2, (source_dim, d_model), dtype=jnp.float32) * 0.05
    wq2 = jax.random.normal(k3, (source_dim, d_model), dtype=jnp.float32) * 0.05
    wk2 = jax.random.normal(k4, (d_model, d_model), dtype=jnp.float32) * 0.05

    rel_sin = jnp.asarray(build_relative_sinusoid(d_model, max_len))

    # Sanity check for the RoPE-style refactor: the registered buffer really is the
    # standard interleaved sinusoid (Phi(j-i) on both triangles) assumed by the kernel.
    half = np.arange(d_model // 2, dtype=np.float64)
    inv_freq = 1.0 / np.power(10000.0, 2.0 * half / d_model)
    ang = np.arange(seq_len, dtype=np.float64)[:, None] * inv_freq[None, :]
    phi_chk = np.stack([np.sin(ang), np.cos(ang)], axis=-1).reshape(seq_len, d_model)
    np.testing.assert_allclose(np.asarray(rel_sin[0, :seq_len]), phi_chk, atol=1e-5)

    edge, align = jump_dot_product(x, mask, wq, wk, wq2, wk2, rel_sin,
                                   out_dtype=jnp.float32)
    jax.block_until_ready((edge, align))

    edge_ref, align_ref = jump_dot_product_ref(x, mask, wq, wk, wq2, wk2, rel_sin)

    # bf16 MXU operands (f32 accumulation) -> loosened tolerance.
    np.testing.assert_allclose(np.asarray(edge), np.asarray(edge_ref), rtol=1e-2, atol=1e-2)
    np.testing.assert_allclose(np.asarray(align), np.asarray(align_ref), rtol=1e-6, atol=1e-6)

    print("KERNEL_OK")
</pallas_src>

<mosaic_0001>
module attributes {stable_mosaic.version = 11 : i64} {
  func.func @jump_dot_product_kernel(%arg0: i32, %arg1: i32, %arg2: memref<1x8x16xbf16, #tpu.memory_space<vmem>>, %arg3: memref<1x8x16xbf16, #tpu.memory_space<vmem>>, %arg4: memref<16x96xbf16, #tpu.memory_space<vmem>>, %arg5: memref<16x32xbf16, #tpu.memory_space<vmem>>, %arg6: memref<8x32xbf16, #tpu.memory_space<vmem>>, %arg7: memref<8x32xf32, #tpu.memory_space<vmem>>, %arg8: memref<8x32xf32, #tpu.memory_space<vmem>>, %arg9: memref<1x8x8xf32, #tpu.memory_space<vmem>>, %arg10: memref<1x8x64xbf16, #tpu.memory_space<vmem>>) attributes {dimension_semantics = [#tpu.dimension_semantics<parallel>, #tpu.dimension_semantics<arbitrary>], iteration_bounds = array<i64: 2, 1>, scalar_prefetch = 0 : i64, scratch_operands = 1 : i64, tpu.core_type = #tpu.core_type<tc>, window_params = [{transform_indices = @transform_0, window_bounds = array<i64: 1, 8, 16>}, {transform_indices = @transform_1, window_bounds = array<i64: 1, 8, 16>}, {pipeline_mode = #tpu.pipeline_mode<synchronous>, transform_indices = @transform_2, window_bounds = array<i64: 16, 96>}, {pipeline_mode = #tpu.pipeline_mode<synchronous>, transform_indices = @transform_3, window_bounds = array<i64: 16, 32>}, {transform_indices = @transform_4, window_bounds = array<i64: 8, 32>}, {pipeline_mode = #tpu.pipeline_mode<synchronous>, transform_indices = @transform_5, window_bounds = array<i64: 8, 32>}, {pipeline_mode = #tpu.pipeline_mode<synchronous>, transform_indices = @transform_6, window_bounds = array<i64: 8, 32>}, {transform_indices = @transform_7, window_bounds = array<i64: 1, 8, 8>}]} {
    %c0_i32 = arith.constant 0 : i32
    %0 = arith.cmpi eq, %arg1, %c0_i32 : i32
    %1 = arith.extui %0 : i1 to i32
    %c0_i32_0 = arith.constant 0 : i32
    %2 = arith.cmpi ne, %1, %c0_i32_0 : i32
    scf.if %2 {
      %c0_14 = arith.constant 0 : index
      %c0_15 = arith.constant 0 : index
      %c0_16 = arith.constant 0 : index
      %15 = vector.load %arg2[%c0_14, %c0_15, %c0_16] : memref<1x8x16xbf16, #tpu.memory_space<vmem>>, vector<1x8x16xbf16>
      %16 = vector.shape_cast %15 : vector<1x8x16xbf16> to vector<8x16xbf16>
      %c0_17 = arith.constant 0 : index
      %c0_18 = arith.constant 0 : index
      %17 = vector.load %arg4[%c0_17, %c0_18] : memref<16x96xbf16, #tpu.memory_space<vmem>>, vector<16x96xbf16>
      %cst_19 = arith.constant dense<0.000000e+00> : vector<8x96xf32>
      %18 = tpu.matmul %16, %17, %cst_19 {dimension_numbers = #tpu.dot_dimension_numbers<[1], [0], [0], [1], [0, 0, 1, 1], [], []>} : vector<8x16xbf16>, vector<16x96xbf16>, vector<8x96xf32> -> vector<8x96xf32>
      %19 = vector.shape_cast %18 : vector<8x96xf32> to vector<1x8x96xf32>
      %20 = vector.extract_strided_slice %19 {offsets = [0, 0, 0], sizes = [1, 8, 32], strides = [1, 1, 1]} : vector<1x8x96xf32> to vector<1x8x32xf32>
      %21 = vector.extract_strided_slice %19 {offsets = [0, 0, 32], sizes = [1, 8, 32], strides = [1, 1, 1]} : vector<1x8x96xf32> to vector<1x8x32xf32>
      %22 = vector.extract_strided_slice %19 {offsets = [0, 0, 64], sizes = [1, 8, 32], strides = [1, 1, 1]} : vector<1x8x96xf32> to vector<1x8x32xf32>
      %c0_20 = arith.constant 0 : index
      %c0_21 = arith.constant 0 : index
      %23 = vector.load %arg7[%c0_20, %c0_21] : memref<8x32xf32, #tpu.memory_space<vmem>>, vector<8x32xf32>
      %24 = vector.shape_cast %23 : vector<8x32xf32> to vector<1x8x32xf32>
      %25 = arith.mulf %21, %24 : vector<1x8x32xf32>
      %c0_22 = arith.constant 0 : index
      %c0_23 = arith.constant 0 : index
      %26 = vector.load %arg8[%c0_22, %c0_23] : memref<8x32xf32, #tpu.memory_space<vmem>>, vector<8x32xf32>
      %27 = vector.shape_cast %26 : vector<8x32xf32> to vector<1x8x32xf32>
      %28 = arith.mulf %22, %27 : vector<1x8x32xf32>
      %29 = arith.addf %25, %28 : vector<1x8x32xf32>
      %30 = tpu.concatenate %20, %29 in 2 : vector<1x8x32xf32>, vector<1x8x32xf32> -> vector<1x8x64xf32>
      %31 = arith.truncf %30 : vector<1x8x64xf32> to vector<1x8x64xbf16>
      %c0_24 = arith.constant 0 : index
      %c0_25 = arith.constant 0 : index
      %c0_26 = arith.constant 0 : index
      %32 = vector.load %arg10[%c0_24, %c0_25, %c0_26] : memref<1x8x64xbf16, #tpu.memory_space<vmem>>, vector<1x8x64xbf16>
      tpu.vector_store %arg10[%c0_24, %c0_25, %c0_26], %31 {strides = array<i32>} : memref<1x8x64xbf16, #tpu.memory_space<vmem>>, vector<1x8x64xbf16>,
    } else {
    }
    %c0 = arith.constant 0 : index
    %c0_1 = arith.constant 0 : index
    %c0_2 = arith.constant 0 : index
    %3 = vector.load %arg3[%c0, %c0_1, %c0_2] : memref<1x8x16xbf16, #tpu.memory_space<vmem>>, vector<1x8x16xbf16>
    %4 = vector.shape_cast %3 : vector<1x8x16xbf16> to vector<8x16xbf16>
    %c0_3 = arith.constant 0 : index
    %c0_4 = arith.constant 0 : index
    %5 = vector.load %arg5[%c0_3, %c0_4] : memref<16x32xbf16, #tpu.memory_space<vmem>>, vector<16x32xbf16>
    %cst = arith.constant dense<0.000000e+00> : vector<8x32xf32>
    %6 = tpu.matmul %4, %5, %cst {dimension_numbers = #tpu.dot_dimension_numbers<[1], [0], [0], [1], [0, 0, 1, 1], [], []>} : vector<8x16xbf16>, vector<16x32xbf16>, vector<8x32xf32> -> vector<8x32xf32>
    %7 = vector.shape_cast %6 : vector<8x32xf32> to vector<1x8x32xf32>
    %c0_5 = arith.constant 0 : index
    %c0_6 = arith.constant 0 : index
    %8 = vector.load %arg6[%c0_5, %c0_6] : memref<8x32xbf16, #tpu.memory_space<vmem>>, vector<8x32xbf16>
    %9 = vector.shape_cast %8 : vector<8x32xbf16> to vector<1x8x32xbf16>
    %10 = arith.truncf %7 : vector<1x8x32xf32> to vector<1x8x32xbf16>
    %11 = tpu.concatenate %10, %9 in 2 : vector<1x8x32xbf16>, vector<1x8x32xbf16> -> vector<1x8x64xbf16>
    %c0_7 = arith.constant 0 : index
    %c0_8 = arith.constant 0 : index
    %c0_9 = arith.constant 0 : index
    %12 = vector.load %arg10[%c0_7, %c0_8, %c0_9] : memref<1x8x64xbf16, #tpu.memory_space<vmem>>, vector<1x8x64xbf16>
    "tpu.trace_start"() <{level = 10 : i32, message = "bid,bjd->bij"}> : () -> ()
    %cst_10 = arith.constant dense<0.000000e+00> : vector<1x8x8xf32>
    %13 = tpu.matmul %12, %11, %cst_10 {dimension_numbers = #tpu.dot_dimension_numbers<[2], [2], [1], [1], [0, 0, 0, 1, 1, 1], [0], [0]>} : vector<1x8x64xbf16>, vector<1x8x64xbf16>, vector<1x8x8xf32> -> vector<1x8x8xf32>
    "tpu.trace_stop"() : () -> ()
    %c0_11 = arith.constant 0 : index
    %c0_12 = arith.constant 0 : index
    %c0_13 = arith.constant 0 : index
    %14 = vector.load %arg9[%c0_11, %c0_12, %c0_13] : memref<1x8x8xf32, #tpu.memory_space<vmem>>, vector<1x8x8xf32>
    tpu.vector_store %arg9[%c0_11, %c0_12, %c0_13], %13 {strides = array<i32>} : memref<1x8x8xf32, #tpu.memory_space<vmem>>, vector<1x8x8xf32>,
    return
  }
  func.func @transform_0(%arg0: i32, %arg1: i32) -> (i32, i32, i32) {
    %c0_i32 = arith.constant 0 : i32
    %c0_i32_0 = arith.constant 0 : i32
    %c0_i32_1 = arith.constant 0 : i32
    return %arg0, %c0_i32, %c0_i32_0 : i32, i32, i32
  }
  func.func @transform_1(%arg0: i32, %arg1: i32) -> (i32, i32, i32) {
    %c0_i32 = arith.constant 0 : i32
    %c0_i32_0 = arith.constant 0 : i32
    return %arg0, %arg1, %c0_i32 : i32, i32, i32
  }
  func.func @transform_2(%arg0: i32, %arg1: i32) -> (i32, i32) {
    %c0_i32 = arith.constant 0 : i32
    %c0_i32_0 = arith.constant 0 : i32
    %c0_i32_1 = arith.constant 0 : i32
    return %c0_i32, %c0_i32_0 : i32, i32
  }
  func.func @transform_3(%arg0: i32, %arg1: i32) -> (i32, i32) {
    %c0_i32 = arith.constant 0 : i32
    %c0_i32_0 = arith.constant 0 : i32
    %c0_i32_1 = arith.constant 0 : i32
    return %c0_i32, %c0_i32_0 : i32, i32
  }
  func.func @transform_4(%arg0: i32, %arg1: i32) -> (i32, i32) {
    %c0_i32 = arith.constant 0 : i32
    %c0_i32_0 = arith.constant 0 : i32
    return %arg1, %c0_i32 : i32, i32
  }
  func.func @transform_5(%arg0: i32, %arg1: i32) -> (i32, i32) {
    %c0_i32 = arith.constant 0 : i32
    %c0_i32_0 = arith.constant 0 : i32
    %c0_i32_1 = arith.constant 0 : i32
    return %c0_i32, %c0_i32_0 : i32, i32
  }
  func.func @transform_6(%arg0: i32, %arg1: i32) -> (i32, i32) {
    %c0_i32 = arith.constant 0 : i32
    %c0_i32_0 = arith.constant 0 : i32
    %c0_i32_1 = arith.constant 0 : i32
    return %c0_i32, %c0_i32_0 : i32, i32
  }
  func.func @transform_7(%arg0: i32, %arg1: i32) -> (i32, i32, i32) {
    %c0_i32 = arith.constant 0 : i32
    %c0_i32_0 = arith.constant 0 : i32
    return %arg0, %c0_i32, %arg1 : i32, i32, i32
  }
}

</mosaic_0001>

<bundles_post_ra>
// kernel: tpu_custom_call.1
= control target key start
LH: loop header
LB: loop body
LE: loop exit
PB: predicated region body
PF: predicated region fallthrough
CT: control target
= control target key end

     0   :  { %s1505_s0 = inlined_call_operand.hbm [shape: bf16[2,8,16], index: 0, kind: input, shape index: {}]   ;;  %s1506_s1 = inlined_call_operand.hbm [shape: bf16[2,8,16], index: 1, kind: input, shape index: {}]   ;;  %s1507_s2 = inlined_call_operand.hbm [shape: bf16[16,96], index: 2, kind: input, shape index: {}]   ;;  %s1508_s3 = inlined_call_operand.vmem [shape: bf16[16,32], index: 3, kind: input, shape index: {}]   ;;  %s1509_s4 = inlined_call_operand.hbm [shape: bf16[8,32], index: 4, kind: input, shape index: {}]   ;;  %s1510_s5 = inlined_call_operand.vmem [shape: f32[8,32], index: 5, kind: input, shape index: {}]   ;;  %s1511_s6 = inlined_call_operand.hbm [shape: f32[8,32], index: 6, kind: input, shape index: {}]   ;;  %s1512_s7 = inlined_call_operand.hbm [shape: f32[2,8,8], index: 7, kind: output, shape index: {}]  }
   0x1   :  { %1520 = sst [smem:[#allocation20_spill]] %s1507_s2 }
   0x2   :  { %1521 = sst [smem:[#allocation21_spill]] %s1509_s4 }
   0x3   :  { %1522 = sst [smem:[#allocation22_spill]] %s1511_s6 }
   0x4   :  { %1523 = sst [smem:[#allocation23_spill]] %s1512_s7 }
   0x5   :  { %12 = vsyncpa [#allocation4], 0 }
   0x6   :  { %14 = vsyncpa [#allocation4 + $0x1], 0 }
   0x7   :  { %15 = vsyncpa [#allocation7], 0 }
   0x8   :  { %17 = vsyncpa [#allocation7 + $0x1], 0 }
   0x9   :  { %18 = vsyncpa [#allocation10], 0 }
   0xa   :  { %19 = vsyncpa [#allocation5], 0 }
   0xb   :  { %21 = vsyncpa [#allocation5 + $0x1], 0  ;;  %s1188_s24 = smov 0   ;;  %s1190_s25 = smov 0  }
   0xc   :  { %s1192_s26 = smov 0   ;;  %s1194_s27 = smov 0  }
   0xd   :  { %s1196_s28 = smov 0   ;;  %s1198_s29 = smov 0  }
   0xe LB: > { %1524 = sst [smem:[#allocation18_spill]] %s1113_s24  ;;  %s1219_s30 = sadd.s32 4294967295, %s1133_s29   ;;  %s1133_s29 = sphi %s1198_s29, %s27_s29   ;;  %s1129_s28 = sphi %s1196_s28, %s1553_s28   ;;  %s1125_s27 = sphi %s1194_s27, %s1552_s27   ;;  %s1121_s26 = sphi %s1192_s26, %s1551_s26   ;;  %s1117_s25 = sphi %s1190_s25, %s1550_s25   ;;  %s1113_s24 = sphi %s1188_s24, %s1549_s24  }
   0xf   : > { %s736_s8 = sadd.s32 4294967294, %s1133_s29   ;;  %p59_p0 = scmp.ne.s32.totalorder %s1117_s25, %s1113_s24 }
  0x10   : > { %p1513_p1 = scmp.eq.s32.totalorder %s1219_s30, 0  ;;  %p229_p3 = scmp.eq.s32.totalorder %s736_s8, 1 }
  0x11   : > { %p737_p5 = scmp.ge.s32.totalorder %s1133_s29, 1  ;;  %p236_p7 = scmp.lt.s32.totalorder %s1133_s29, 3 }
  0x12   : > { %p1228_p4 = por %p1513_p1, %p59_p0  ;;  %p1233_p6 = por %p229_p3, %p59_p0 }
  0x13   : > { %p1238_p8 = pnand %p737_p5, %p236_p7  ;;  %s1135_s12 = smov [#allocation8]  }
  0x14   : > { %s1525_s9 = scalar_select %p1228_p4, 1, 0 }
  0x15   : > { %s1526_s10 = scalar_select %p1233_p6, 1, 0 }
  0x16   : > { %s1528_s11 = scalar_select %p1238_p8, 1, 0 }
  0x17   : > { %1527 = sst [smem:[#allocation19_spill]] %s1526_s10  ;;  %s248_s13 = sshll.u32 %s1135_s12, 4  ;;  %s1242_s13 = int_to_ptr.vmem [resolvable:$true] %s248_s13 }
  0x18   : > { %p805_p9 = pneg %p1238_p8  ;;  %s1136_s15 = smov [#allocation9]  }
  0x19   : > { %s267_s16 = sshll.u32 %s1136_s15, 4  ;;  %s1137_s17 = smov [#allocation11]   ;;  %s1253_s16 = int_to_ptr.vmem [resolvable:$true] %s267_s16 }
  0x1a   : > { %p1249_p11 = pnand %p805_p9, %p1513_p1  ;;  %s1255_s18 = sshll.u32 %s1137_s17, 4  ;;  %s282_s18 = int_to_ptr.vmem [resolvable:$true] %s1255_s18 }
  0x1b   : > { %s1530_s2 = sld [smem:[#allocation20_spill]] }
  0x1c   : > { %p1265_p13 = pneg %p1249_p11 }
  0x21   : > { %s895_s21 = scalar_lea.hbm %s1530_s2, 128 }
  0x22   : > { %p896_p12 = scmp.ne.s32.totalorder %s1530_s2, %s895_s21  ;;  %p902_p5 = scmp.lt.u32.totalorder %s895_s21, %s1530_s2 }
  0x24   : > { %p898_p0 = pnand %p1265_p13, %p896_p12 }
  0x26   : > { %p899_p3 = pneg %p898_p0 }
  0x28   : > { %p904_p7 = pnand %p902_p5, %p899_p3 }
  0x2a   : > { %907 = shalt.err (!%p904_p7)
}
  0x2b   : > { %s908_s17 = scalar_lea.vmem %s1242_s13, 128  ;;  %p916_p2 = scmp.lt.s32.totalorder %s1242_s13, %s1242_s13 }
  0x2c   : > { %p909_p9 = scmp.ne.s32.totalorder %s1242_s13, %s908_s17  ;;  %p917_p6 = scmp.lt.s32.totalorder %s908_s17, %s908_s17 }
  0x2e   : > { %p911_p10 = pnand %p909_p9, %p1265_p13  ;;  %p918_p12 = por %p917_p6, %p916_p2 }
  0x30   : > { %p912_p1 = pneg %p911_p10 }
  0x32   : > { %p919_p0 = pnand %p918_p12, %p912_p1 }
  0x34   : > { %922 = shalt.err (!%p919_p0)
}
  0x35   : > { %s1138_s19 = smov 64   ;;  %s1139_s20 = smov 4  }
  0x36   : > { %808 = dma.hbm_to_vmem [thread:$0]  (!%p1249_p11), %s1530_s2, 128, %s1242_s13, [#allocation7], %s1138_s19, %s1138_s19, %s1139_s20  }
  0x37   : > { %s1532_s4 = sld [smem:[#allocation21_spill]] }
  0x3d   : > { %s923_s15 = scalar_lea.hbm %s1532_s4, 64 }
  0x3e   : > { %p924_p2 = scmp.ne.s32.totalorder %s1532_s4, %s923_s15  ;;  %p930_p10 = scmp.lt.u32.totalorder %s923_s15, %s1532_s4 }
  0x40   : > { %p926_p1 = pnand %p924_p2, %p1265_p13 }
  0x42   : > { %p927_p6 = pneg %p926_p1 }
  0x44   : > { %p932_p3 = pnand %p930_p10, %p927_p6 }
  0x46   : > { %935 = shalt.err (!%p932_p3)
}
  0x47   : > { %s936_s13 = scalar_lea.vmem %s1253_s16, 64  ;;  %p944_p12 = scmp.lt.s32.totalorder %s1253_s16, %s1253_s16 }
  0x48   : > { %p937_p5 = scmp.ne.s32.totalorder %s1253_s16, %s936_s13  ;;  %p945_p0 = scmp.lt.s32.totalorder %s936_s13, %s936_s13 }
  0x4a   : > { %p939_p7 = pnand %p937_p5, %p1265_p13  ;;  %p946_p2 = por %p945_p0, %p944_p12 }
  0x4c   : > { %p940_p9 = pneg %p939_p7 }
  0x4e   : > { %p947_p1 = pnand %p946_p2, %p940_p9 }
  0x50   : > { %950 = shalt.err (!%p947_p1)
}
  0x51   : > { %811 = dma.hbm_to_vmem [thread:$0]  (!%p1249_p11), %s1532_s4, 64, %s1253_s16, [#allocation10]  }
  0x52   : > { %s1533_s6 = sld [smem:[#allocation22_spill]] }
  0x58   : > { %s951_s20 = scalar_lea.hbm %s1533_s6, 128 }
  0x59   : > { %p952_p6 = scmp.ne.s32.totalorder %s1533_s6, %s951_s20  ;;  %p958_p5 = scmp.lt.u32.totalorder %s951_s20, %s1533_s6 }
  0x5b   : > { %p954_p10 = pnand %p952_p6, %p1265_p13 }
  0x5d   : > { %p955_p3 = pneg %p954_p10 }
  0x5f   : > { %p960_p7 = pnand %p958_p5, %p955_p3 }
  0x61   : > { %963 = shalt.err (!%p960_p7)
}
  0x62   : > { %s964_s15 = scalar_lea.vmem %s282_s18, 128  ;;  %p972_p2 = scmp.lt.s32.totalorder %s282_s18, %s282_s18 }
  0x63   : > { %p965_p9 = scmp.ne.s32.totalorder %s282_s18, %s964_s15  ;;  %p973_p1 = scmp.lt.s32.totalorder %s964_s15, %s964_s15 }
  0x65   : > { %p967_p12 = pnand %p965_p9, %p1265_p13  ;;  %p974_p4 = por %p973_p1, %p972_p2 }
  0x67   : > { %p968_p0 = pneg %p967_p12 }
  0x69   : > { %p975_p8 = pnand %p974_p4, %p968_p0 }
  0x6b   : > { %978 = shalt.err (!%p975_p8)
}
  0x6c   : > { %814 = dma.hbm_to_vmem [thread:$0]  (!%p1249_p11), %s1533_s6, 128, %s282_s18, [#allocation10]  }
  0x6d   : > { %s46_s8 = sadd.s32 1, %s1121_s26  ;;  %s39_s13 = sadd.s32 1, %s1129_s28 }
  0x6e   : > { %p53_p4 = scmp.ne.s32.totalorder %s1121_s26, %s1117_s25  ;;  %p41_p8 = scmp.ge.s32.totalorder %s39_s13, 2 }
  0x6f   : > { %p54_p13 = scmp.eq.s32.totalorder %s1133_s29, 0  ;;  %p1534_p6 = scmp.eq.s32.totalorder %s1219_s30, 1 }
  0x70   : > { %p829_p3 = scmp.lt.s32.totalorder %s1133_s29, 2  ;;  %s1555_s13 = smov (%p41_p8, %s39_s13), 0 }
  0x71   : > { %p1335_p10 = por %p1534_p6, %p53_p4  ;;  %p55_p5 = por %p54_p13, %p53_p4 }
  0x72   : > { %s292_s7 = sand.u32 1, %s1121_s26   ;;  %s43_s24 = ssub.s32 %s1129_s28, %s1555_s13 }
  0x73   : > { %s1535_s14 = scalar_select %p1335_p10, 1, 0 }
  0x74   : > { %p44_p11 = scmp.eq.s32.totalorder %s43_s24, 0  ;;  %s1345_s18 = sshll.u32 %s292_s7, 2 }
  0x75   : > { %s743_s10 = sshll.u32 %s1129_s28, 6  ;;  %s296_s23 = scalar_lea.vmem [#allocation3], %s1345_s18 }
  0x76   : > { %s1349_s19 = scalar_select %p44_p11, %s1121_s26, %s46_s8  }
  0x77   : > { %s1354_s22 = scalar_lea.hbm %s1505_s0, %s743_s10  ;;  %s303_s12 = sshll.u32 %s296_s23, 4  ;;  %s1357_s12 = int_to_ptr.vmem [resolvable:$true] %s303_s12 }
  0x78   : > { %p1361_p7 = pnand %p829_p3, %p55_p5  ;;  %s1368_s8 = scalar_lea.hbm %s1506_s1, %s743_s10 }
  0x79   : > { %s310_s24 = sand.u32 1, %s1133_s29   ;;  %s293_s20 = scalar_lea.sflag [#allocation4], %s292_s7 }
  0x7a   : > { %s979_s21 = scalar_lea.hbm %s1354_s22, 64  ;;  %p981_p12 = pneg %p1361_p7 }
  0x7b   : > { %p980_p9 = scmp.ne.s32.totalorder %s1354_s22, %s979_s21  ;;  %s984_s4 = scalar_lea.hbm %s1505_s0, 128 }
  0x7c   : > { %p985_p1 = scmp.lt.u32.totalorder %s1354_s22, %s1505_s0  ;;  %p986_p4 = scmp.lt.u32.totalorder %s984_s4, %s979_s21 }
  0x7d   : > { %p982_p0 = pnand %p981_p12, %p980_p9  ;;  %p988_p13 = scmp.lt.u32.totalorder %s979_s21, %s1354_s22 }
  0x7e   : > { %p987_p8 = por %p986_p4, %p985_p1 }
  0x7f   : > { %p983_p2 = pneg %p982_p0 }
  0x80   : > { %p989_p6 = por %p988_p13, %p987_p8 }
  0x82   : > { %p990_p3 = pnand %p989_p6, %p983_p2 }
  0x84   : > { %993 = shalt.err (!%p990_p3)
}
  0x85   : > { %s994_s7 = scalar_lea.vmem %s1357_s12, 64  ;;  %s1140_s2 = smov [#allocation3]  }
  0x86   : > { %p995_p5 = scmp.ne.s32.totalorder %s1357_s12, %s994_s7  ;;  %s999_s10 = sshll.u32 %s1140_s2, 4  ;;  %s1000_s10 = int_to_ptr.vmem [resolvable:$false] %s999_s10 }
  0x87   : > { %s1001_s6 = scalar_lea.vmem %s1000_s10, 128  ;;  %p1002_p0 = scmp.lt.s32.totalorder %s1357_s12, %s1000_s10 }
  0x88   : > { %p997_p11 = pnand %p995_p5, %p981_p12  ;;  %p1003_p1 = scmp.lt.s32.totalorder %s1001_s6, %s994_s7 }
  0x8a   : > { %p998_p9 = pneg %p997_p11  ;;  %p1004_p4 = por %p1003_p1, %p1002_p0 }
  0x8c   : > { %p1005_p8 = pnand %p1004_p4, %p998_p9 }
  0x8e   : > { %1008 = shalt.err (!%p1005_p8)
}
  0x8f   : > { %818 = dma.hbm_to_vmem [thread:$0]  (!%p1361_p7), %s1354_s22, 64, %s1357_s12, %s293_s20  }
  0x90   : > { %s314_s4 = scalar_lea.vmem [#allocation6], %s1345_s18  ;;  %s311_s21 = scalar_lea.sflag [#allocation7], %s310_s24 }
  0x91   : > { %s322_s17 = sshll.u32 %s314_s4, 4  ;;  %s1009_s23 = scalar_lea.hbm %s1368_s8, 64  ;;  %s323_s17 = int_to_ptr.vmem [resolvable:$true] %s322_s17 }
  0x92   : > { %p1010_p2 = scmp.ne.s32.totalorder %s1368_s8, %s1009_s23  ;;  %s1014_s2 = scalar_lea.hbm %s1506_s1, 128 }
  0x93   : > { %p1015_p3 = scmp.lt.u32.totalorder %s1368_s8, %s1506_s1  ;;  %p1016_p5 = scmp.lt.u32.totalorder %s1014_s2, %s1009_s23 }
  0x94   : > { %p1012_p13 = pnand %p1010_p2, %p981_p12  ;;  %p1018_p9 = scmp.lt.u32.totalorder %s1009_s23, %s1368_s8 }
  0x95   : > { %p1017_p11 = por %p1016_p5, %p1015_p3 }
  0x96   : > { %p1013_p6 = pneg %p1012_p13 }
  0x97   : > { %p1019_p0 = por %p1018_p9, %p1017_p11 }
  0x99   : > { %p1020_p1 = pnand %p1019_p0, %p1013_p6 }
  0x9b   : > { %1023 = shalt.err (!%p1020_p1)
}
  0x9c   : > { %s1024_s18 = scalar_lea.vmem %s323_s17, 64  ;;  %s1141_s22 = smov [#allocation6]  }
  0x9d   : > { %p1025_p4 = scmp.ne.s32.totalorder %s323_s17, %s1024_s18  ;;  %s1029_s12 = sshll.u32 %s1141_s22, 4  ;;  %s1030_s12 = int_to_ptr.vmem [resolvable:$false] %s1029_s12 }
  0x9e   : > { %s1031_s24 = scalar_lea.vmem %s1030_s12, 128  ;;  %p1032_p13 = scmp.lt.s32.totalorder %s323_s17, %s1030_s12 }
  0x9f   : > { %p1027_p8 = pnand %p1025_p4, %p981_p12  ;;  %p1033_p10 = scmp.lt.s32.totalorder %s1031_s24, %s1024_s18 }
  0xa1   : > { %p1028_p2 = pneg %p1027_p8  ;;  %p1034_p3 = por %p1033_p10, %p1032_p13 }
  0xa3   : > { %p1035_p5 = pnand %p1034_p3, %p1028_p2 }
  0xa5   : > { %1038 = shalt.err (!%p1035_p5)
}
  0xa6   : > { %821 = dma.hbm_to_vmem [thread:$0]  (!%p1361_p7), %s1368_s8, 64, %s323_s17, %s311_s21  }
  0xa7   : > { %p1537_p6 = scmp.ne.s32.totalorder %s1528_s11, 0 }
  0xa8   : > { %s1421_s20 = sand.u32 (!%p1537_p6), 1, %s1117_s25   ;;  %p1538_p12 = scmp.ne.s32.totalorder (!%p1537_p6), %s1525_s9, 0 }
  0xa9   : > { %331 = sbr.rel (%p1537_p6) target bundleno = 762 (0x2fa), region = 48  ;;  %s747_s4 = sshll.u32 (!%p1537_p6), %s1421_s20, 2 }
  0xaa   : > { %s334_s23 = scalar_lea.sflag (!%p1537_p6), [#allocation4], %s1421_s20  ;;  %s337_s16 = scalar_lea.vmem (!%p1537_p6), [#allocation3], %s747_s4 }
  0xb0   : > { %1092 = dma.done.wait (%p1538_p12), %s334_s23, 64  }
  0xb1   : > { %1094 = vsyncadd (%p1538_p12), %s334_s23, 4294967232  ;;  %s342_s15 = sand.u32 1, %s1219_s30   ;;  %s346_s11 = scalar_lea.vmem [#allocation6], %s747_s4 }
  0xb2   : > { %s343_s8 = scalar_lea.sflag [#allocation7], %s342_s15 }
  0xb3   : > { %1096 = dma.done.wait (%p1538_p12), %s343_s8, 64  }
  0xb4   : > { %1098 = vsyncadd (%p1538_p12), %s343_s8, 4294967232  ;;  %p1539_p10 = scmp.eq.s32.totalorder %s1219_s30, 0 }
  0xb6   : > { %1100 = dma.done.wait (%p1539_p10), [#allocation7], 128   ;;  %p1540_p7 = pmov %p1539_p10 }
  0xb8   : > { %1102 = vsyncadd (%p1540_p7), [#allocation7], 4294967168  ;;  %p1541_p11 = pmov %p1540_p7 }
  0xb9   : > { %p1542_p9 = pmov %p1540_p7 }
  0xba   : > { %1104 = dma.done.wait (%p1541_p11), [#allocation10], 192  }
  0xbb   : > { %1106 = vsyncadd (%p1542_p9), [#allocation10], 4294967104  ;;  %v1142_v0 = vmov 0.0   ;;  %vm1143_vm0 = vmmov 0   ;;  %v892_v1 = vld [vmem:[#allocation8] sm:$0xff]   ;;  %v458_v3 = vld [vmem:[#allocation11] sm:$0xff] }
  0xbc   : > { %769 = vmatprep.subr.bf16.mxu0 %v1142_v0  ;;  %771 = vmatprep.mubr.msk.bf16.mxu0 %vm1143_vm0, %v1142_v0  ;;  %v399_v2 = vld [vmem:[%s337_s16] sm:$0xf]  ;;  %vm408_vm1 = vcmask 130048   ;;  %s1144_s9 = smov 64   ;;  %v474_v6 = vld [vmem:[%s346_s11] sm:$0xf] }
  0xbd   : > { %775 = vmatprep.subr.bf16.mxu1 %v1142_v0  ;;  %777 = vmatprep.mubr.msk.bf16.mxu1 %vm1143_vm0, %v1142_v0  ;;  %v893_v4 = vld [vmem:[%s1508_s3] sm:$0xff]   ;;  %s1145_s2 = smov 32   ;;  %s1146_s10 = smov 96   ;;  %v894_v14 = vld [vmem:[#allocation9] ss:$0 sps:$4 sm:$0xff]   ;;  %vm469_vm2 = vcmask 261120  }
  0xbe   : > { %770 = vmatpush3.bf16.msra.mxu0 %v892_v1  ;;  %460 = vrot.lane.b32.xlu0 %v458_v3, %s1144_s9  ;;  %v452_v5 = vld [vmem:[%s1510_s5] sm:$0xff]  ;;  %vm472_vm3 = vcmask 519168   ;;  %vm539_vm4 = vcmask 523264   ;;  %s752_s6 = sshll.u32 %s1421_s20, 3  ;;  %s760_s18 = sshll.u32 %s1125_s27, 7  ;;  %vm585_vm5 = vcmask 64512  }
  0xbf   : > { %781 = vmatprep.subr.bf16.mxu0 %v1142_v0  ;;  %776 = vmatpush3.bf16.msra.mxu1 %v893_v4  ;;  %s393_s22 = scalar_lea.vmem [#allocation12], %s752_s6  ;;  %s1543_s23 = sld [smem:[#allocation23_spill]] }
  0xc0   : > { %s602_s12 = sshll.u32 %s393_s22, 4  ;;  %s588_s15 = scalar_lea.sflag [#allocation5], %s1421_s20  ;;  %s1458_s12 = int_to_ptr.vmem [resolvable:$true] %s602_s12 }
  0xc1   : > { %772 = vmatmul.mubr.msk.bf16.vlgmr.msra.gmra.mrb[0].mxu0 %vm408_vm1, %v399_v2  ;;  %s1039_s8 = scalar_lea.vmem %s1458_s12, 128  ;;  %p1544_p1 = scmp.ne.s32.totalorder %s1535_s14, 0 }
  0xc2   : > { %454 = vrot.lane.b32.xlu0 %v452_v5, %s1145_s2  ;;  %783 = vmatprep.mubr.msk.bf16.mxu0 %vm1143_vm0, %v1142_v0  ;;  %p1040_p0 = scmp.ne.s32.totalorder %s1458_s12, %s1039_s8  ;;  %s1147_s27 = smov [#allocation12]  }
  0xc3   : > { %778 = vmatmul.mubr.msk.bf16.vlgmr.msra.gmra.mrb[0].mxu1 %vm408_vm1, %v474_v6  ;;  %s1043_s11 = sshll.u32 %s1147_s27, 4  ;;  %s1044_s11 = int_to_ptr.vmem [resolvable:$false] %s1043_s11 }
  0xc4   : > { %p1041_p4 = pnand %p1040_p0, %p1544_p1  ;;  %s1045_s9 = scalar_lea.vmem %s1044_s11, 256 }
  0xc5   : > { %s1456_s16 = scalar_lea.hbm %s1543_s23, %s760_s18  ;;  %p1046_p2 = scmp.lt.s32.totalorder %s1458_s12, %s1044_s11 }
  0xc6   : > { %p1042_p8 = pneg %p1041_p4  ;;  %p1047_p13 = scmp.lt.s32.totalorder %s1045_s9, %s1039_s8 }
  0xc8   : > { %p1048_p3 = por %p1047_p13, %p1046_p2 }
  0xca   : > { %p1049_p5 = pnand %p1048_p3, %p1042_p8 }
 0x130   : > { %v461_v7 = vpop.permute.xlu0 %460 }
 0x134   : > { %v455_v18 = vpop.permute.xlu0 %454 }
 0x194   : > { %v446_v8 = vpop.f32.mrb[0].mxu0 }
 0x195   : > { %v773_v9 = vpop.f32.mrb[1].mxu0  ;;  %v463_v10 = vmul.f32 %v461_v7, %v446_v8  ;;  %v457_v19 = vmul.f32 %v455_v18, %v446_v8 }
 0x196   : > { %v449_v11 = vpop.f32.mrb[2].mxu0  ;;  %v521_v12 = vpop.f32.mrb[0].mxu1 }
 0x197   : > { %465 = vrot.lane.b32.xlu1 %v463_v10, %s1146_s10  ;;  %v774_v13 = vpop.f32.mrb[3].mxu0  ;;  %v779_v15 = vpop.f32.mrb[1].mxu1  ;;  %v528_v21 = vpack.c.bf16 %v521_v12, %v521_v12 }
 0x198   : > { %v524_v16 = vpop.f32.mrb[2].mxu1 }
 0x199   : > { %v780_v17 = vpop.f32.mrb[3].mxu1 }
 0x19b   : > { %532 = vrot.lane.b32.xlu1 %v894_v14, %s1145_s2 }
 0x209   : > { %v466_v20 = vpop.permute.xlu1 %465 }
 0x20a   : > { %v468_v22 = vadd.f32 %v466_v20, %v457_v19 }
 0x20c   : > { %v470_v23 = vsel %vm469_vm2, %v446_v8, %v468_v22 }
 0x20d   : > { %v533_v24 = vpop.permute.xlu1 %532  ;;  %v471_v25 = vpack.c.bf16 %v470_v23, %v470_v23 }
 0x20e   : > { %v537_v26 = vsel %vm469_vm2, %v528_v21, %v533_v24 }
 0x20f   : > { %473 = vst.msk [vmem:[#allocation2] sm:$0xf] %vm472_vm3, %v471_v25  ;;  %v543_v27 = vsel %vm539_vm4, %v537_v26, 0 }
 0x210   : > { %782 = vmatpush3.bf16.xpose.msra.mxu0 %v543_v27 }
 0x216   : > { %v538_v28 = vld [vmem:[#allocation2] sm:$0xf] }
 0x217   : > { %784 = vmatmul.mubr.msk.bf16.vlgmr.msra.gmra.mrb[4].mxu0 %vm539_vm4, %v538_v28 }
 0x2ea   : > { %v579_v29 = vpop.f32.mrb[4].mxu0 }
 0x2eb   : > { %586 = vst.msk [vmem:[%s393_s22] sm:$0xff] %vm585_vm5, %v579_v29  ;;  %v785_v30 = vpop.f32.mrb[5].mxu0 }
 0x2ec   : > { %v582_v31 = vpop.f32.mrb[6].mxu0 }
 0x2ed   : > { %1052 = shalt.err (!%p1049_p5)
}
 0x2ee   : > { %s1053_s20 = scalar_lea.hbm %s1456_s16, 128  ;;  %s1057_s30 = scalar_lea.hbm %s1543_s23, 256 }
 0x2ef   : > { %p1054_p6 = scmp.ne.s32.totalorder %s1456_s16, %s1053_s20  ;;  %p1058_p7 = scmp.lt.u32.totalorder %s1456_s16, %s1543_s23 }
 0x2f0   : > { %p1059_p11 = scmp.lt.u32.totalorder %s1057_s30, %s1053_s20  ;;  %p1061_p0 = scmp.lt.u32.totalorder %s1053_s20, %s1456_s16 }
 0x2f1   : > { %p1055_p12 = pnand %p1054_p6, %p1544_p1 }
 0x2f2   : > { %p1060_p9 = por %p1059_p11, %p1058_p7 }
 0x2f3   : > { %p1056_p10 = pneg %p1055_p12 }
 0x2f4   : > { %p1062_p4 = por %p1061_p0, %p1060_p9 }
 0x2f6   : > { %p1063_p8 = pnand %p1062_p4, %p1056_p10 }
 0x2f8   : > { %1066 = shalt.err (!%p1063_p8)
}
 0x2f9   : > { %803 = dma.vmem_to_hbm [thread:$0]  (%p1544_p1), %s1458_s12, 128, %s1456_s16, %s588_s15   ;;  %v786_v32 = vpop.f32.mrb[7].mxu0 }
 0x2fa PF: > { %s1545_s10 = sld [smem:[#allocation18_spill]]  ;;  %s1546_s6 = sld [smem:[#allocation19_spill]] }
 0x2fb   : > { %p1548_p13 = scmp.ge.s32.totalorder %s1133_s29, 2 }
 0x300   : > { %s614_s18 = sand.u32 1, %s1545_s10   ;;  %p1547_p2 = scmp.ne.s32.totalorder %s1546_s6, 0 }
 0x301   : > { %s615_s22 = scalar_lea.sflag [#allocation5], %s614_s18 }
 0x302   : > { %p823_p3 = pnand %p1548_p13, %p1547_p2 }
 0x304   : > { %1108 = dma.done.wait (!%p823_p3), %s615_s22, 128  }
 0x305   : > { %1110 = vsyncadd (!%p823_p3), %s615_s22, 4294967168  ;;  %s27_s29 = sadd.s32 1, %s1133_s29   ;;  %s1549_s24 = smov %s1117_s25 }
 0x306   : > { %p24_p5 = scmp.ge.s32.totalorder %s27_s29, 4   ;;  %s1550_s25 = smov %s1121_s26 }
 0x307   : > { %s1551_s26 = smov %s1349_s19  ;;  %s1552_s27 = smov %s1129_s28 }
 0x308   : > { %s1553_s28 = smov %s1555_s13  ;;  %26 = sbr.rel (!%p24_p5) target bundleno = 14 (0xe), region = 123 }
 0x30f   :  { %620 = vsyncpa [#allocation4], 1 }
 0x310   :  { %622 = vsyncpa [#allocation4 + $0x1], 1 }
 0x311   :  { %623 = vsyncpa [#allocation7], 1 }
 0x312   :  { %625 = vsyncpa [#allocation7 + $0x1], 1 }
 0x313   :  { %626 = vsyncpa [#allocation10], 1 }
 0x314   :  { %627 = vsyncpa [#allocation5], 1 }
 0x315   :  { %629 = vsyncpa [#allocation5 + $0x1], 1 }

</bundles_post_ra>
